<compile_context>
chip_gen: v6e
topology: v6e:2x2x1
jax: 0.10.0
libtpu: 0.0.40
codegen_flags: <defaults>
</compile_context>

<pallas_src>
import jax
import jax.numpy as jnp
from jax.experimental import pallas as pl
from jax.experimental.pallas import tpu as pltpu

BN_EPS = 1e-5
LANE = 128


def _round_up(x, m):
    return (x + m - 1) // m * m


# ---- Pass 1: conv matmul (MXU) + per-channel sum / sum-of-squares ----------
def conv_stats_kernel(p_ref, w_ref, conv_ref, sum_ref, sq_ref):
    i = pl.program_id(0)
    acc = jnp.dot(p_ref[...], w_ref[...], preferred_element_type=jnp.float32)
    conv_ref[...] = acc

    @pl.when(i == 0)
    def _():
        sum_ref[...] = jnp.zeros_like(sum_ref)
        sq_ref[...] = jnp.zeros_like(sq_ref)

    sum_ref[...] += jnp.sum(acc, axis=0, keepdims=True)
    sq_ref[...] += jnp.sum(acc * acc, axis=0, keepdims=True)


# ---- Pass 2: y = conv * scale + shift, then ReLU ---------------------------
def bn_relu_kernel(conv_ref, scale_ref, shift_ref, o_ref):
    y = conv_ref[...] * scale_ref[...] + shift_ref[...]
    o_ref[...] = jnp.maximum(y, 0.0).astype(o_ref.dtype)


def conv_bn_relu(x_nchw, w, b, gamma, beta, *, stride=1, padding=1, tm=256):
    # Conv bias is mathematically cancelled by the BatchNorm mean subtraction,
    # so it is not used (output is bit-for-bit the same semantics).
    del b
    N, Cin, H, W = x_nchw.shape
    Cout, _, Kh, Kw = w.shape

    # ---- glue: NCHW -> NHWC, zero-pad, im2col (patch order kh, kw, cin) ----
    x = jnp.transpose(x_nchw, (0, 2, 3, 1)).astype(jnp.float32)
    xp = jnp.pad(x, ((0, 0), (padding, padding), (padding, padding), (0, 0)))
    Ho = (H + 2 * padding - Kh) // stride + 1
    Wo = (W + 2 * padding - Kw) // stride + 1

    # TODO(synk): build the Kh*Kw shifted patch views in-kernel from NHWC row
    # bands instead of materializing the full im2col matrix in HBM (would cut
    # HBM read traffic by roughly the kernel-height factor on this mem-bound op).
    patches = []
    for kh in range(Kh):
        for kw in range(Kw):
            patches.append(
                xp[:, kh:kh + stride * Ho:stride, kw:kw + stride * Wo:stride, :]
            )
    P = jnp.concatenate(patches, axis=-1).reshape(N * Ho * Wo, Kh * Kw * Cin)

    M, KKC = P.shape
    KKCp = _round_up(KKC, LANE)     # lane-align the MXU contraction dim
    Coutp = _round_up(Cout, LANE)   # lane-dense output stores / MXU N dim
    Mp = _round_up(M, tm)           # rows padded to a multiple of the M tile
    n_tiles = Mp // tm

    # bf16 inputs (f32 accumulation inside the kernel); zero-pad K, Cout, M.
    # Zero-padded rows produce conv output == 0 -> contribute nothing to the
    # channel statistics, which are divided by the *real* row count M below.
    P = jnp.pad(P, ((0, Mp - M), (0, KKCp - KKC))).astype(jnp.bfloat16)

    # weight [Cout, Cin, Kh, Kw] -> [Kh*Kw*Cin, Cout] -> padded [KKCp, Coutp]
    Wm = jnp.transpose(w, (2, 3, 1, 0)).reshape(Kh * Kw * Cin, Cout)
    Wm = jnp.pad(Wm.astype(jnp.float32),
                 ((0, KKCp - KKC), (0, Coutp - Cout))).astype(jnp.bfloat16)

    # ---- pass 1: conv + running per-channel sum / sumsq --------------------
    conv_flat, ch_sum, ch_sq = pl.pallas_call(
        conv_stats_kernel,
        out_shape=(
            jax.ShapeDtypeStruct((Mp, Coutp), jnp.float32),
            jax.ShapeDtypeStruct((1, Coutp), jnp.float32),
            jax.ShapeDtypeStruct((1, Coutp), jnp.float32),
        ),
        grid_spec=pltpu.PrefetchScalarGridSpec(
            num_scalar_prefetch=0,
            grid=(n_tiles,),
            in_specs=[
                pl.BlockSpec((tm, KKCp), lambda i: (i, 0)),
                pl.BlockSpec((KKCp, Coutp), lambda i: (0, 0)),
            ],
            out_specs=(
                pl.BlockSpec((tm, Coutp), lambda i: (i, 0)),
                pl.BlockSpec((1, Coutp), lambda i: (0, 0)),
                pl.BlockSpec((1, Coutp), lambda i: (0, 0)),
            ),
        ),
        compiler_params=pltpu.CompilerParams(
            dimension_semantics=("arbitrary",),
        ),
    )(P, Wm)

    # ---- finalize BN statistics (tiny (1, Coutp) arrays, plain XLA) --------
    # TODO(synk): PyTorch BatchNorm2d (training) also updates running_mean /
    # running_var (unbiased); only the forward output is produced here.
    inv_m = jnp.float32(1.0 / M)
    mean = ch_sum * inv_m
    var = jnp.maximum(ch_sq * inv_m - mean * mean, 0.0)
    g_pad = jnp.pad(gamma.astype(jnp.float32).reshape(1, Cout),
                    ((0, 0), (0, Coutp - Cout)))
    bt_pad = jnp.pad(beta.astype(jnp.float32).reshape(1, Cout),
                     ((0, 0), (0, Coutp - Cout)))
    scale = g_pad * jax.lax.rsqrt(var + BN_EPS)
    shift = bt_pad - mean * scale

    # ---- pass 2: normalize + ReLU (fully parallel over row tiles) ----------
    out_flat = pl.pallas_call(
        bn_relu_kernel,
        out_shape=jax.ShapeDtypeStruct((Mp, Coutp), jnp.float32),
        grid_spec=pltpu.PrefetchScalarGridSpec(
            num_scalar_prefetch=0,
            grid=(n_tiles,),
            in_specs=[
                pl.BlockSpec((tm, Coutp), lambda i: (i, 0)),
                pl.BlockSpec((1, Coutp), lambda i: (0, 0)),
                pl.BlockSpec((1, Coutp), lambda i: (0, 0)),
            ],
            out_specs=pl.BlockSpec((tm, Coutp), lambda i: (i, 0)),
        ),
        compiler_params=pltpu.CompilerParams(
            dimension_semantics=("parallel",),
        ),
    )(conv_flat, scale, shift)

    # strip padding, back to NCHW
    out = out_flat[:M, :Cout].reshape(N, Ho, Wo, Cout)
    return jnp.transpose(out, (0, 3, 1, 2))


if __name__ == "__main__":
    # channelx = (4, 8), kernel=3, stride=1, padding=1
    N, Cin, Cout, H, W = 2, 4, 8, 16, 16
    K = 3

    key = jax.random.PRNGKey(0)
    kx, kw, kb, kg, kbt = jax.random.split(key, 5)

    x = jax.random.normal(kx, (N, Cin, H, W), dtype=jnp.float32)
    w = jax.random.normal(kw, (Cout, Cin, K, K), dtype=jnp.float32) * 0.1
    b = jax.random.normal(kb, (Cout,), dtype=jnp.float32) * 0.1
    gamma = 1.0 + 0.1 * jax.random.normal(kg, (Cout,), dtype=jnp.float32)
    beta = 0.1 * jax.random.normal(kbt, (Cout,), dtype=jnp.float32)

    y = conv_bn_relu(x, w, b, gamma, beta, stride=1, padding=1)
    y = jax.block_until_ready(y)

    # pure-JAX f32 reference (conv bias included; BN cancels it exactly)
    ref_conv = jax.lax.conv_general_dilated(
        x, w, window_strides=(1, 1), padding=((1, 1), (1, 1)),
        dimension_numbers=("NCHW", "OIHW", "NCHW"),
    ) + b.reshape(1, Cout, 1, 1)
    m = jnp.mean(ref_conv, axis=(0, 2, 3), keepdims=True)
    v = jnp.mean((ref_conv - m) ** 2, axis=(0, 2, 3), keepdims=True)
    ref = jnp.maximum(
        (ref_conv - m) / jnp.sqrt(v + BN_EPS) * gamma.reshape(1, Cout, 1, 1)
        + beta.reshape(1, Cout, 1, 1),
        0.0,
    )
    assert y.shape == (N, Cout, H, W)
    # bf16 matmul operands vs f32 reference: allow bf16-level tolerance
    err = float(jnp.max(jnp.abs(y - ref)))
    assert err < 5e-2, err

    print("KERNEL_OK")
</pallas_src>

<mosaic_0001>
module attributes {stable_mosaic.version = 11 : i64} {
  func.func @conv_stats_kernel(%arg0: i32, %arg1: memref<256x128xbf16, #tpu.memory_space<vmem>>, %arg2: memref<128x128xbf16, #tpu.memory_space<vmem>>, %arg3: memref<256x128xf32, #tpu.memory_space<vmem>>, %arg4: memref<1x128xf32, #tpu.memory_space<vmem>>, %arg5: memref<1x128xf32, #tpu.memory_space<vmem>>) attributes {dimension_semantics = [#tpu.dimension_semantics<arbitrary>], iteration_bounds = array<i64: 2>, scalar_prefetch = 0 : i64, scratch_operands = 0 : i64, tpu.core_type = #tpu.core_type<tc>, window_params = [{transform_indices = @transform_0, window_bounds = array<i64: 256, 128>}, {pipeline_mode = #tpu.pipeline_mode<synchronous>, transform_indices = @transform_1, window_bounds = array<i64: 128, 128>}, {transform_indices = @transform_2, window_bounds = array<i64: 256, 128>}, {pipeline_mode = #tpu.pipeline_mode<synchronous>, transform_indices = @transform_3, window_bounds = array<i64: 1, 128>}, {pipeline_mode = #tpu.pipeline_mode<synchronous>, transform_indices = @transform_4, window_bounds = array<i64: 1, 128>}]} {
    %c0 = arith.constant 0 : index
    %c0_0 = arith.constant 0 : index
    %0 = vector.load %arg1[%c0, %c0_0] : memref<256x128xbf16, #tpu.memory_space<vmem>>, vector<256x128xbf16>
    %c0_1 = arith.constant 0 : index
    %c0_2 = arith.constant 0 : index
    %1 = vector.load %arg2[%c0_1, %c0_2] : memref<128x128xbf16, #tpu.memory_space<vmem>>, vector<128x128xbf16>
    %cst = arith.constant dense<0.000000e+00> : vector<256x128xf32>
    %2 = tpu.matmul %0, %1, %cst {dimension_numbers = #tpu.dot_dimension_numbers<[1], [0], [0], [1], [0, 0, 1, 1], [], []>} : vector<256x128xbf16>, vector<128x128xbf16>, vector<256x128xf32> -> vector<256x128xf32>
    %c0_3 = arith.constant 0 : index
    %c0_4 = arith.constant 0 : index
    %3 = vector.load %arg3[%c0_3, %c0_4] : memref<256x128xf32, #tpu.memory_space<vmem>>, vector<256x128xf32>
    tpu.vector_store %arg3[%c0_3, %c0_4], %2 {strides = array<i32>} : memref<256x128xf32, #tpu.memory_space<vmem>>, vector<256x128xf32>,
    %c0_i32 = arith.constant 0 : i32
    %4 = arith.cmpi eq, %arg0, %c0_i32 : i32
    %5 = arith.extui %4 : i1 to i32
    %c0_i32_5 = arith.constant 0 : i32
    %6 = arith.cmpi ne, %5, %c0_i32_5 : i32
    scf.if %6 {
      %cst_16 = arith.constant 0.000000e+00 : f32
      %18 = vector.broadcast %cst_16 : f32 to vector<1x128xf32>
      %c0_17 = arith.constant 0 : index
      %c0_18 = arith.constant 0 : index
      %19 = vector.load %arg4[%c0_17, %c0_18] : memref<1x128xf32, #tpu.memory_space<vmem>>, vector<1x128xf32>
      tpu.vector_store %arg4[%c0_17, %c0_18], %18 {strides = array<i32>} : memref<1x128xf32, #tpu.memory_space<vmem>>, vector<1x128xf32>,
      %cst_19 = arith.constant 0.000000e+00 : f32
      %20 = vector.broadcast %cst_19 : f32 to vector<1x128xf32>
      %c0_20 = arith.constant 0 : index
      %c0_21 = arith.constant 0 : index
      %21 = vector.load %arg5[%c0_20, %c0_21] : memref<1x128xf32, #tpu.memory_space<vmem>>, vector<1x128xf32>
      tpu.vector_store %arg5[%c0_20, %c0_21], %20 {strides = array<i32>} : memref<1x128xf32, #tpu.memory_space<vmem>>, vector<1x128xf32>,
    } else {
    }
    %c0_6 = arith.constant 0 : index
    %c0_7 = arith.constant 0 : index
    %7 = vector.load %arg4[%c0_6, %c0_7] : memref<1x128xf32, #tpu.memory_space<vmem>>, vector<1x128xf32>
    %cst_8 = arith.constant dense<0.000000e+00> : vector<128xf32>
    %8 = vector.multi_reduction <add>, %2, %cst_8 [0] : vector<256x128xf32> to vector<128xf32>
    %9 = vector.shape_cast %8 : vector<128xf32> to vector<1x128xf32>
    %10 = arith.addf %7, %9 : vector<1x128xf32>
    %c0_9 = arith.constant 0 : index
    %c0_10 = arith.constant 0 : index
    %11 = vector.load %arg4[%c0_9, %c0_10] : memref<1x128xf32, #tpu.memory_space<vmem>>, vector<1x128xf32>
    tpu.vector_store %arg4[%c0_9, %c0_10], %10 {strides = array<i32>} : memref<1x128xf32, #tpu.memory_space<vmem>>, vector<1x128xf32>,
    %c0_11 = arith.constant 0 : index
    %c0_12 = arith.constant 0 : index
    %12 = vector.load %arg5[%c0_11, %c0_12] : memref<1x128xf32, #tpu.memory_space<vmem>>, vector<1x128xf32>
    %13 = arith.mulf %2, %2 : vector<256x128xf32>
    %cst_13 = arith.constant dense<0.000000e+00> : vector<128xf32>
    %14 = vector.multi_reduction <add>, %13, %cst_13 [0] : vector<256x128xf32> to vector<128xf32>
    %15 = vector.shape_cast %14 : vector<128xf32> to vector<1x128xf32>
    %16 = arith.addf %12, %15 : vector<1x128xf32>
    %c0_14 = arith.constant 0 : index
    %c0_15 = arith.constant 0 : index
    %17 = vector.load %arg5[%c0_14, %c0_15] : memref<1x128xf32, #tpu.memory_space<vmem>>, vector<1x128xf32>
    tpu.vector_store %arg5[%c0_14, %c0_15], %16 {strides = array<i32>} : memref<1x128xf32, #tpu.memory_space<vmem>>, vector<1x128xf32>,
    return
  }
  func.func @transform_0(%arg0: i32) -> (i32, i32) {
    %c0_i32 = arith.constant 0 : i32
    %c0_i32_0 = arith.constant 0 : i32
    return %arg0, %c0_i32 : i32, i32
  }
  func.func @transform_1(%arg0: i32) -> (i32, i32) {
    %c0_i32 = arith.constant 0 : i32
    %c0_i32_0 = arith.constant 0 : i32
    %c0_i32_1 = arith.constant 0 : i32
    return %c0_i32, %c0_i32_0 : i32, i32
  }
  func.func @transform_2(%arg0: i32) -> (i32, i32) {
    %c0_i32 = arith.constant 0 : i32
    %c0_i32_0 = arith.constant 0 : i32
    return %arg0, %c0_i32 : i32, i32
  }
  func.func @transform_3(%arg0: i32) -> (i32, i32) {
    %c0_i32 = arith.constant 0 : i32
    %c0_i32_0 = arith.constant 0 : i32
    %c0_i32_1 = arith.constant 0 : i32
    return %c0_i32, %c0_i32_0 : i32, i32
  }
  func.func @transform_4(%arg0: i32) -> (i32, i32) {
    %c0_i32 = arith.constant 0 : i32
    %c0_i32_0 = arith.constant 0 : i32
    %c0_i32_1 = arith.constant 0 : i32
    return %c0_i32, %c0_i32_0 : i32, i32
  }
}

</mosaic_0001>

<bundles_post_ra>
// kernel: tpu_custom_call.1
= control target key start
LH: loop header
LB: loop body
LE: loop exit
PB: predicated region body
PF: predicated region fallthrough
CT: control target
= control target key end

     0   :  { %10 = vsyncpa [#allocation3], 0  ;;  %s1769_s0 = inlined_call_operand.hbm [shape: bf16[512,128], index: 0, kind: input, shape index: {}]   ;;  %s1770_s1 = inlined_call_operand.hbm [shape: bf16[128,128], index: 1, kind: input, shape index: {}]   ;;  %s1771_s2 = inlined_call_operand.hbm [shape: f32[512,128], index: 2, kind: output, shape index: {0}]   ;;  %s1772_s3 = inlined_call_operand.hbm [shape: f32[1,128], index: 3, kind: output, shape index: {1}]   ;;  %s1773_s4 = inlined_call_operand.hbm [shape: f32[1,128], index: 4, kind: output, shape index: {2}]  }
   0x1   :  { %12 = vsyncpa [#allocation3 + $0x1], 0 }
   0x2   :  { %13 = vsyncpa [#allocation6], 0 }
   0x3   :  { %14 = vsyncpa [#allocation4], 0 }
   0x4   :  { %16 = vsyncpa [#allocation4 + $0x1], 0 }
   0x5   :  { %17 = vsyncpa [#allocation9], 0  ;;  %s1319_s15 = smov 0   ;;  %s1321_s16 = smov 0  }
   0x6   :  { %s1323_s17 = smov 0   ;;  %s1325_s18 = smov 0  }
   0x7 LB: > { %s1340_s19 = sadd.s32 4294967295, %s1282_s18   ;;  %s873_s20 = sadd.s32 4294967294, %s1282_s18   ;;  %s1282_s18 = sphi %s1325_s18, %s1802_s18   ;;  %s1278_s17 = sphi %s1323_s17, %s1801_s17   ;;  %s1274_s16 = sphi %s1321_s16, %s1800_s16   ;;  %s1270_s15 = sphi %s1319_s15, %s1799_s15  }
   0x8   : > { %p43_p0 = scmp.ne.s32.totalorder %s1274_s16, %s1270_s15  ;;  %p1774_p1 = scmp.eq.s32.totalorder %s1340_s19, 0 }
   0x9   : > { %p94_p3 = scmp.eq.s32.totalorder %s873_s20, 1  ;;  %p874_p5 = scmp.ge.s32.totalorder %s1282_s18, 1 }
   0xa   : > { %p1349_p4 = por %p1774_p1, %p43_p0  ;;  %p143_p7 = scmp.lt.s32.totalorder %s1282_s18, 3 }
   0xb   : > { %p1354_p6 = por %p94_p3, %p43_p0  ;;  %s1284_s24 = smov [#allocation5]  }
   0xc   : > { %s1778_s21 = scalar_select %p1349_p4, 1, 0 }
   0xd   : > { %s1779_s22 = scalar_select %p1354_p6, 1, 0 }
   0xe   : > { %p1360_p9 = pnand %p874_p5, %p143_p7  ;;  %s155_s25 = sshll.u32 %s1284_s24, 4  ;;  %s156_s25 = int_to_ptr.vmem [resolvable:$true] %s155_s25 }
   0xf   : > { %s1374_s27 = sadd.s32 1, %s1282_s18   ;;  %s30_s28 = sadd.s32 1, %s1278_s17 }
  0x10   : > { %s1780_s23 = scalar_select %p1360_p9, 1, 0 }
  0x11   : > { %p1024_p10 = pneg %p1360_p9  ;;  %s27_s29 = ssub.s32 %s1282_s18, %s1374_s27 }
  0x12   : > { %s1119_s30 = scalar_lea.vmem %s156_s25, 1024  ;;  %p1127_p7 = scmp.lt.s32.totalorder %s156_s25, %s156_s25 }
  0x13   : > { %p1369_p12 = pnand %p1024_p10, %p1774_p1  ;;  %p1120_p0 = scmp.ne.s32.totalorder %s156_s25, %s1119_s30 }
  0x14   : > { %p1128_p8 = scmp.lt.s32.totalorder %s1119_s30, %s1119_s30 }
  0x15   : > { %p1110_p13 = pneg %p1369_p12 }
  0x16   : > { %p1129_p11 = por %p1128_p8, %p1127_p7 }
  0x17   : > { %p1122_p3 = pnand %p1120_p0, %p1110_p13 }
  0x19   : > { %p1123_p5 = pneg %p1122_p3 }
  0x1b   : > { %p1130_p2 = pnand %p1129_p11, %p1123_p5 }
  0x1d   : > { %1133 = shalt.err (!%p1130_p2)
}
  0x1e   : > { %s1285_s5 = smov 64   ;;  %s1286_s6 = smov 4  }
  0x1f   : > { %1027 = dma.hbm_to_vmem [thread:$0]  (!%p1369_p12), %s1770_s1, 1024, %s156_s25, [#allocation6], %s1285_s5, %s1285_s5, %s1286_s6  }
  0x20   : > { %p28_p2 = scmp.eq.s32.totalorder %s27_s29, 0  ;;  %p37_p8 = scmp.ne.s32.totalorder %s1278_s17, %s1274_s16 }
  0x21   : > { %p38_p10 = scmp.eq.s32.totalorder %s1282_s18, 0  ;;  %p1037_p11 = scmp.lt.s32.totalorder %s1282_s18, 2 }
  0x22   : > { %s1394_s9 = scalar_select %p28_p2, %s1278_s17, %s30_s28  }
  0x23   : > { %p39_p13 = por %p38_p10, %p37_p8  ;;  %p1782_p0 = scmp.eq.s32.totalorder %s1340_s19, 1 }
  0x24   : > { %s169_s11 = sand.u32 1, %s1278_s17   ;;  %s918_s12 = sshll.u32 %s1282_s18, 11 }
  0x25   : > { %p1398_p3 = por %p1782_p0, %p37_p8  ;;  %s877_s13 = sshll.u32 %s169_s11, 7 }
  0x26   : > { %s1407_s24 = scalar_lea.hbm %s1769_s0, %s918_s12  ;;  %s173_s25 = scalar_lea.vmem [#allocation2], %s877_s13 }
  0x27   : > { %s1783_s10 = scalar_select %p1398_p3, 1, 0 }
  0x28   : > { %s180_s26 = sshll.u32 %s173_s25, 4  ;;  %p1409_p12 = pnand %p1037_p11, %p39_p13  ;;  %s1413_s26 = int_to_ptr.vmem [resolvable:$true] %s180_s26 }
  0x29   : > { %s1415_s29 = scalar_lea.sflag [#allocation3], %s169_s11  ;;  %s1134_s30 = scalar_lea.hbm %s1407_s24, 2048 }
  0x2a   : > { %p1135_p5 = scmp.ne.s32.totalorder %s1407_s24, %s1134_s30  ;;  %p1136_p7 = pneg %p1409_p12 }
  0x2b   : > { %s1139_s12 = scalar_lea.hbm %s1769_s0, 4096  ;;  %p1140_p10 = scmp.lt.s32.totalorder %s1407_s24, %s1769_s0 }
  0x2c   : > { %p1137_p2 = pnand %p1136_p7, %p1135_p5  ;;  %p1141_p11 = scmp.lt.s32.totalorder %s1139_s12, %s1134_s30 }
  0x2e   : > { %p1138_p8 = pneg %p1137_p2  ;;  %p1142_p13 = por %p1141_p11, %p1140_p10 }
  0x30   : > { %p1143_p0 = pnand %p1142_p13, %p1138_p8 }
  0x32   : > { %1146 = shalt.err (!%p1143_p0)
}
  0x33   : > { %s1147_s11 = scalar_lea.vmem %s1413_s26, 2048  ;;  %s1287_s20 = smov [#allocation2]  }
  0x34   : > { %p1148_p1 = scmp.ne.s32.totalorder %s1413_s26, %s1147_s11  ;;  %s1152_s25 = sshll.u32 %s1287_s20, 4  ;;  %s1153_s25 = int_to_ptr.vmem [resolvable:$false] %s1152_s25 }
  0x35   : > { %s1154_s7 = scalar_lea.vmem %s1153_s25, 4096  ;;  %p1155_p2 = scmp.lt.s32.totalorder %s1413_s26, %s1153_s25 }
  0x36   : > { %p1150_p6 = pnand %p1148_p1, %p1136_p7  ;;  %p1156_p3 = scmp.lt.s32.totalorder %s1154_s7, %s1147_s11 }
  0x38   : > { %p1151_p5 = pneg %p1150_p6  ;;  %p1157_p4 = por %p1156_p3, %p1155_p2 }
  0x3a   : > { %p1158_p9 = pnand %p1157_p4, %p1151_p5 }
  0x3c   : > { %1161 = shalt.err (!%p1158_p9)
}
  0x3d   : > { %1031 = dma.hbm_to_vmem [thread:$0]  (!%p1409_p12), %s1407_s24, 2048, %s1413_s26, %s1415_s29, %s1285_s5, %s1285_s5, %s1286_s6  }
  0x3e   : > { %p1785_p1 = scmp.ne.s32.totalorder %s1780_s23, 0 }
  0x3f   : > { %s1442_s30 = sand.u32 (!%p1785_p1), 1, %s1274_s16   ;;  %p1786_p4 = scmp.ne.s32.totalorder (!%p1785_p1), %s1778_s21, 0 }
  0x40   : > { %192 = sbr.rel (%p1785_p1) target bundleno = 444 (0x1bc), region = 28  ;;  %s881_s8 = sshll.u32 (!%p1785_p1), %s1442_s30, 7 }
  0x41   : > { %s195_s12 = scalar_lea.sflag (!%p1785_p1), [#allocation3], %s1442_s30  ;;  %s1446_s13 = scalar_lea.vmem (!%p1785_p1), [#allocation2], %s881_s8 }
  0x45   : > { %1253 = dma.done.wait (%p1786_p4), %s195_s12, 2048  }
  0x46   : > { %1255 = vsyncadd (%p1786_p4), %s195_s12, 4294965248  ;;  %p1787_p6 = scmp.eq.s32.totalorder %s1340_s19, 0 }
  0x48   : > { %1257 = dma.done.wait (%p1787_p6), [#allocation6], 1024   ;;  %p1788_p9 = pmov %p1787_p6 }
  0x49   : > { %v1084_v0 = vld [vmem:[#allocation5 + $0x38] sm:$0xff]   ;;  %v1085_v1 = vld [vmem:[#allocation5 + $0x30] sm:$0xff]   ;;  %v1086_v2 = vld [vmem:[#allocation5 + $0x28] sm:$0xff]   ;;  %s883_s21 = sshll.u32 %s1442_s30, 8  ;;  %p1789_p3 = scmp.ne.s32.totalorder %s1340_s19, 0 }
  0x4a   : > { %1259 = vsyncadd (%p1788_p9), [#allocation6], 4294966272  ;;  %944 = vmatprep.subr.bf16.mxu0 %v1084_v0  ;;  %992 = vmatprep.subr.bf16.mxu1 %v1084_v0  ;;  %v1087_v3 = vld [vmem:[#allocation5 + $0x20] sm:$0xff]   ;;  %v1088_v6 = vld [vmem:[#allocation5 + $0x18] sm:$0xff]   ;;  %s1477_s23 = scalar_lea.vmem [#allocation7], %s883_s21 }
  0x4b   : > { %945 = vmatpush3.bf16.msra.mxu0 %v1084_v0  ;;  %1000 = vmatpush3.bf16.msra.mxu1 %v1084_v0  ;;  %v1092_v4 = vld [vmem:[%s1446_s13] sm:$0xff]   ;;  %v1089_v7 = vld [vmem:[#allocation5 + $0x10] sm:$0xff]   ;;  %v1090_v8 = vld [vmem:[#allocation5 + $0x8] sm:$0xff]  }
  0x4c   : > { %946 = vmatprep.subr.bf16.mxu0 %v1085_v1  ;;  %993 = vmatprep.subr.bf16.mxu1 %v1085_v1  ;;  %v1093_v5 = vld [vmem:[%s1446_s13 + $0x40] sm:$0xff]   ;;  %v1094_v10 = vld [vmem:[%s1446_s13 + $0x8] sm:$0xff]   ;;  %v1096_v12 = vld [vmem:[%s1446_s13 + $0x10] sm:$0xff]  }
  0x4d   : > { %960 = vmatprep.mubr.bf16.mxu0 %v1092_v4  ;;  %976 = vmatprep.mubr.bf16.mxu1 %v1093_v5  ;;  %v1091_v9 = vld [vmem:[#allocation5] sm:$0xff]   ;;  %v1095_v11 = vld [vmem:[%s1446_s13 + $0x48] sm:$0xff]   ;;  %v1097_v13 = vld [vmem:[%s1446_s13 + $0x50] sm:$0xff]  }
  0x4e   : > { %v1098_v14 = vld [vmem:[%s1446_s13 + $0x18] sm:$0xff]   ;;  %v1100_v16 = vld [vmem:[%s1446_s13 + $0x20] sm:$0xff]   ;;  %v1102_v18 = vld [vmem:[%s1446_s13 + $0x28] sm:$0xff]  }
  0x4f   : > { %947 = vmatpush3.bf16.msra.mxu0 %v1085_v1  ;;  %1001 = vmatpush3.bf16.msra.mxu1 %v1085_v1  ;;  %v1099_v15 = vld [vmem:[%s1446_s13 + $0x58] sm:$0xff]   ;;  %v1101_v17 = vld [vmem:[%s1446_s13 + $0x60] sm:$0xff]   ;;  %v1103_v19 = vld [vmem:[%s1446_s13 + $0x68] sm:$0xff]  }
  0x50   : > { %948 = vmatprep.subr.bf16.mxu0 %v1086_v2  ;;  %994 = vmatprep.subr.bf16.mxu1 %v1086_v2  ;;  %v1104_v20 = vld [vmem:[%s1446_s13 + $0x30] sm:$0xff]   ;;  %v1106_v22 = vld [vmem:[%s1446_s13 + $0x38] sm:$0xff]  }
  0x51   : > { %v1105_v21 = vld [vmem:[%s1446_s13 + $0x70] sm:$0xff]   ;;  %v1107_v23 = vld [vmem:[%s1446_s13 + $0x78] sm:$0xff]  }
  0x53   : > { %949 = vmatpush3.bf16.msra.mxu0 %v1086_v2  ;;  %1002 = vmatpush3.bf16.msra.mxu1 %v1086_v2 }
  0x54   : > { %950 = vmatprep.subr.bf16.mxu0 %v1087_v3  ;;  %995 = vmatprep.subr.bf16.mxu1 %v1087_v3 }
  0x57   : > { %951 = vmatpush3.bf16.msra.mxu0 %v1087_v3  ;;  %1003 = vmatpush3.bf16.msra.mxu1 %v1087_v3 }
  0x58   : > { %952 = vmatprep.subr.bf16.mxu0 %v1088_v6  ;;  %996 = vmatprep.subr.bf16.mxu1 %v1088_v6 }
  0x5b   : > { %953 = vmatpush3.bf16.msra.mxu0 %v1088_v6  ;;  %1004 = vmatpush3.bf16.msra.mxu1 %v1088_v6 }
  0x5c   : > { %954 = vmatprep.subr.bf16.mxu0 %v1089_v7  ;;  %997 = vmatprep.subr.bf16.mxu1 %v1089_v7 }
  0x5f   : > { %955 = vmatpush3.bf16.msra.mxu0 %v1089_v7  ;;  %1005 = vmatpush3.bf16.msra.mxu1 %v1089_v7 }
  0x60   : > { %956 = vmatprep.subr.bf16.mxu0 %v1090_v8  ;;  %998 = vmatprep.subr.bf16.mxu1 %v1090_v8 }
  0x63   : > { %957 = vmatpush3.bf16.msra.mxu0 %v1090_v8  ;;  %1006 = vmatpush3.bf16.msra.mxu1 %v1090_v8 }
  0x64   : > { %958 = vmatprep.subr.bf16.mxu0 %v1091_v9  ;;  %999 = vmatprep.subr.bf16.mxu1 %v1091_v9 }
  0x67   : > { %959 = vmatpush3.bf16.msra.mxu0 %v1091_v9  ;;  %1007 = vmatpush3.bf16.msra.mxu1 %v1091_v9 }
  0x6a   : > { %961 = vmatmul.mubr.bf16.vlgmr.msra.gmra.mxu0 %v1094_v10  ;;  %977 = vmatmul.mubr.bf16.vlgmr.msra.gmra.mxu1 %v1095_v11 }
  0x6b   : > { %964 = vmatprep.mubr.bf16.mxu0 %v1096_v12  ;;  %980 = vmatprep.mubr.bf16.mxu1 %v1097_v13 }
  0x72   : > { %965 = vmatmul.mubr.bf16.gmra.mxu0 %v1098_v14  ;;  %981 = vmatmul.mubr.bf16.gmra.mxu1 %v1099_v15 }
  0x73   : > { %968 = vmatprep.mubr.bf16.mxu0 %v1100_v16  ;;  %984 = vmatprep.mubr.bf16.mxu1 %v1101_v17 }
  0x7a   : > { %969 = vmatmul.mubr.bf16.gmra.mxu0 %v1102_v18  ;;  %985 = vmatmul.mubr.bf16.gmra.mxu1 %v1103_v19 }
  0x7b   : > { %972 = vmatprep.mubr.bf16.mxu0 %v1104_v20  ;;  %988 = vmatprep.mubr.bf16.mxu1 %v1105_v21 }
  0x82   : > { %973 = vmatmul.mubr.bf16.gmra.mxu0 %v1106_v22  ;;  %989 = vmatmul.mubr.bf16.gmra.mxu1 %v1107_v23 }
 0x12a   : > { %v1473_v24 = vpop.f32.mrf.mxu0  ;;  %v1475_v25 = vpop.f32.mrf.mxu1 }
 0x12b   : > { %585 = vst [vmem:[%s1477_s23 + $0x10] sm:$0xff] %v1473_v24  ;;  %601 = vst [vmem:[%s1477_s23 + $0x90] sm:$0xff] %v1475_v25 }
 0x12c   : > { %v1483_v26 = vpop.f32.mrf.mxu0  ;;  %v1485_v27 = vpop.f32.mrf.mxu1 }
 0x12d   : > { %583 = vst [vmem:[%s1477_s23] sm:$0xff] %v1483_v26  ;;  %599 = vst [vmem:[%s1477_s23 + $0x80] sm:$0xff] %v1485_v27 }
 0x12e   : > { %v1491_v28 = vpop.f32.mrf.mxu0  ;;  %v1493_v29 = vpop.f32.mrf.mxu1 }
 0x12f   : > { %586 = vst [vmem:[%s1477_s23 + $0x18] sm:$0xff] %v1491_v28  ;;  %602 = vst [vmem:[%s1477_s23 + $0x98] sm:$0xff] %v1493_v29 }
 0x130   : > { %v1499_v30 = vpop.f32.mrf.mxu0  ;;  %v1501_v31 = vpop.f32.mrf.mxu1 }
 0x131   : > { %584 = vst [vmem:[%s1477_s23 + $0x8] sm:$0xff] %v1499_v30  ;;  %600 = vst [vmem:[%s1477_s23 + $0x88] sm:$0xff] %v1501_v31 }
 0x132   : > { %v1507_v32 = vpop.f32.mrf.mxu0  ;;  %v1509_v33 = vpop.f32.mrf.mxu1 }
 0x133   : > { %589 = vst [vmem:[%s1477_s23 + $0x30] sm:$0xff] %v1507_v32  ;;  %605 = vst [vmem:[%s1477_s23 + $0xb0] sm:$0xff] %v1509_v33 }
 0x134   : > { %v1515_v34 = vpop.f32.mrf.mxu0  ;;  %v1517_v35 = vpop.f32.mrf.mxu1 }
 0x135   : > { %587 = vst [vmem:[%s1477_s23 + $0x20] sm:$0xff] %v1515_v34  ;;  %603 = vst [vmem:[%s1477_s23 + $0xa0] sm:$0xff] %v1517_v35 }
 0x136   : > { %v1523_v36 = vpop.f32.mrf.mxu0  ;;  %v1525_v37 = vpop.f32.mrf.mxu1 }
 0x137   : > { %590 = vst [vmem:[%s1477_s23 + $0x38] sm:$0xff] %v1523_v36  ;;  %606 = vst [vmem:[%s1477_s23 + $0xb8] sm:$0xff] %v1525_v37 }
 0x138   : > { %v1531_v38 = vpop.f32.mrf.mxu0  ;;  %v1533_v39 = vpop.f32.mrf.mxu1 }
 0x139   : > { %588 = vst [vmem:[%s1477_s23 + $0x28] sm:$0xff] %v1531_v38  ;;  %604 = vst [vmem:[%s1477_s23 + $0xa8] sm:$0xff] %v1533_v39 }
 0x13a   : > { %v1539_v40 = vpop.f32.mrf.mxu0  ;;  %v1541_v41 = vpop.f32.mrf.mxu1 }
 0x13b   : > { %593 = vst [vmem:[%s1477_s23 + $0x50] sm:$0xff] %v1539_v40  ;;  %609 = vst [vmem:[%s1477_s23 + $0xd0] sm:$0xff] %v1541_v41 }
 0x13c   : > { %v1547_v42 = vpop.f32.mrf.mxu0  ;;  %v1549_v43 = vpop.f32.mrf.mxu1 }
 0x13d   : > { %591 = vst [vmem:[%s1477_s23 + $0x40] sm:$0xff] %v1547_v42  ;;  %607 = vst [vmem:[%s1477_s23 + $0xc0] sm:$0xff] %v1549_v43 }
 0x13e   : > { %v1555_v44 = vpop.f32.mrf.mxu0  ;;  %v1557_v45 = vpop.f32.mrf.mxu1 }
 0x13f   : > { %594 = vst [vmem:[%s1477_s23 + $0x58] sm:$0xff] %v1555_v44  ;;  %610 = vst [vmem:[%s1477_s23 + $0xd8] sm:$0xff] %v1557_v45 }
 0x140   : > { %v1563_v46 = vpop.f32.mrf.mxu0  ;;  %v1565_v47 = vpop.f32.mrf.mxu1 }
 0x141   : > { %592 = vst [vmem:[%s1477_s23 + $0x48] sm:$0xff] %v1563_v46  ;;  %608 = vst [vmem:[%s1477_s23 + $0xc8] sm:$0xff] %v1565_v47 }
 0x142   : > { %v1571_v48 = vpop.f32.mrf.mxu0  ;;  %v1573_v49 = vpop.f32.mrf.mxu1 }
 0x143   : > { %597 = vst [vmem:[%s1477_s23 + $0x70] sm:$0xff] %v1571_v48  ;;  %613 = vst [vmem:[%s1477_s23 + $0xf0] sm:$0xff] %v1573_v49 }
 0x144   : > { %v1579_v50 = vpop.f32.mrf.mxu0  ;;  %v1581_v51 = vpop.f32.mrf.mxu1 }
 0x145   : > { %595 = vst [vmem:[%s1477_s23 + $0x60] sm:$0xff] %v1579_v50  ;;  %611 = vst [vmem:[%s1477_s23 + $0xe0] sm:$0xff] %v1581_v51  ;;  %618 = sbr.rel (%p1789_p3) target bundleno = 332 (0x14c), region = 40 }
 0x146   : > { %v1587_v52 = vpop.f32.mrf.mxu0  ;;  %v1589_v53 = vpop.f32.mrf.mxu1 }
 0x147   : > { %598 = vst [vmem:[%s1477_s23 + $0x78] sm:$0xff] %v1587_v52  ;;  %614 = vst [vmem:[%s1477_s23 + $0xf8] sm:$0xff] %v1589_v53 }
 0x148   : > { %v1595_v54 = vpop.f32.mrf.mxu0  ;;  %v1597_v55 = vpop.f32.mrf.mxu1 }
 0x149   : > { %596 = vst [vmem:[%s1477_s23 + $0x68] sm:$0xff] %v1595_v54  ;;  %612 = vst [vmem:[%s1477_s23 + $0xe8] sm:$0xff] %v1597_v55 }
 0x14a   : > { %v1288_v56 = vmov 0.0  }
 0x14b   : > { %619 = vst [vmem:[#allocation8] sm:$0x1] %v1288_v56  ;;  %620 = vst [vmem:[#allocation10] sm:$0x1] %v1288_v56 }
 0x14c PF: > { %v622_v57 = vadd.f32 %v1499_v30, %v1483_v26  ;;  %s919_s5 = sshll.u32 %s1340_s19, 12  ;;  %s747_s28 = sshll.u32 %s1477_s23, 4  ;;  %v662_v60 = vmul.f32 %v1483_v26, %v1483_v26  ;;  %v663_v61 = vmul.f32 %v1499_v30, %v1499_v30  ;;  %s1616_s28 = int_to_ptr.vmem [resolvable:$true] %s747_s28 }
 0x14d   : > { %s1612_s26 = scalar_lea.hbm %s1771_s2, %s919_s5  ;;  %s734_s29 = scalar_lea.sflag [#allocation4], %s1442_s30 }
 0x14e   : > { %v623_v58 = vadd.f32 %v1473_v24, %v622_v57  ;;  %s1162_s14 = scalar_lea.vmem %s1616_s28, 4096  ;;  %p1790_p7 = scmp.ne.s32.totalorder %s1783_s10, 0 }
 0x14f   : > { %p1163_p12 = scmp.ne.s32.totalorder %s1616_s28, %s1162_s14  ;;  %s1289_s11 = smov [#allocation7]  }
 0x150   : > { %v624_v59 = vadd.f32 %v1491_v28, %v623_v58  ;;  %s1166_s20 = sshll.u32 %s1289_s11, 4  ;;  %s1167_s20 = int_to_ptr.vmem [resolvable:$false] %s1166_s20 }
 0x151   : > { %p1164_p8 = pnand %p1163_p12, %p1790_p7  ;;  %s1168_s25 = scalar_lea.vmem %s1167_s20, 8192 }
 0x152   : > { %v625_v62 = vadd.f32 %v624_v59, %v1515_v34  ;;  %p1169_p11 = scmp.lt.s32.totalorder %s1616_s28, %s1167_s20  ;;  %p1170_p13 = scmp.lt.s32.totalorder %s1168_s25, %s1162_s14 }
 0x153   : > { %p1165_p10 = pneg %p1164_p8 }
 0x154   : > { %p1171_p0 = por %p1170_p13, %p1169_p11 }
 0x156   : > { %p1172_p5 = pnand %p1171_p0, %p1165_p10 }
 0x158   : > { %1175 = shalt.err (!%p1172_p5)
}
 0x159   : > { %s1176_s7 = scalar_lea.hbm %s1612_s26, 4096  ;;  %s1180_s13 = scalar_lea.hbm %s1771_s2, 8192 }
 0x15a   : > { %p1177_p2 = scmp.ne.s32.totalorder %s1612_s26, %s1176_s7  ;;  %p1181_p6 = scmp.lt.s32.totalorder %s1612_s26, %s1771_s2 }
 0x15b   : > { %p1182_p9 = scmp.lt.s32.totalorder %s1180_s13, %s1176_s7 }
 0x15c   : > { %p1178_p1 = pnand %p1177_p2, %p1790_p7 }
 0x15d   : > { %p1183_p3 = por %p1182_p9, %p1181_p6 }
 0x15e   : > { %p1179_p4 = pneg %p1178_p1 }
 0x160   : > { %p1184_p12 = pnand %p1183_p3, %p1179_p4 }
 0x162   : > { %1187 = shalt.err (!%p1184_p12)
}
 0x163   : > { %s1290_s5 = smov 128   ;;  %s1291_s6 = smov 8   ;;  %v664_v63 = vmul.f32 %v1473_v24, %v1473_v24  ;;  %v626_v0 = vadd.f32 %v625_v62, %v1531_v38  ;;  %v665_v1 = vmul.f32 %v1491_v28, %v1491_v28  ;;  %v694_v2 = vadd.f32 %v663_v61, %v662_v60 }
 0x164   : > { %1014 = dma.vmem_to_hbm [thread:$0]  (%p1790_p7), %s1616_s28, 4096, %s1612_s26, %s734_s29, %s1290_s5, %s1290_s5, %s1291_s6   ;;  %v666_v4 = vmul.f32 %v1515_v34, %v1515_v34  ;;  %v667_v7 = vmul.f32 %v1531_v38, %v1531_v38  ;;  %v668_v10 = vmul.f32 %v1507_v32, %v1507_v32  ;;  %v669_v13 = vmul.f32 %v1523_v36, %v1523_v36 }
 0x165   : > { %v627_v3 = vadd.f32 %v1507_v32, %v626_v0  ;;  %v695_v5 = vadd.f32 %v694_v2, %v664_v63  ;;  %v670_v16 = vmul.f32 %v1547_v42, %v1547_v42  ;;  %v671_v19 = vmul.f32 %v1563_v46, %v1563_v46  ;;  %s1292_s10 = smov [#allocation8]   ;;  %p1791_p8 = scmp.eq.s32.totalorder %s1340_s19, 1 }
 0x166   : > { %v672_v22 = vmul.f32 %v1539_v40, %v1539_v40  ;;  %v673_v26 = vmul.f32 %v1555_v44, %v1555_v44  ;;  %v674_v32 = vmul.f32 %v1579_v50, %v1579_v50  ;;  %v675_v38 = vmul.f32 %v1595_v54, %v1595_v54  ;;  %s761_s30 = sshll.u32 %s1292_s10, 4  ;;  %s762_s30 = int_to_ptr.vmem [resolvable:$true] %s761_s30 }
 0x167   : > { %v628_v6 = vadd.f32 %v1523_v36, %v627_v3  ;;  %v696_v8 = vadd.f32 %v695_v5, %v665_v1  ;;  %v677_v57 = vmul.f32 %v1587_v52, %v1587_v52  ;;  %v678_v59 = vmul.f32 %v1485_v27, %v1485_v27  ;;  %s1188_s24 = scalar_lea.vmem %s762_s30, 16  ;;  %s1194_s26 = scalar_lea.vmem %s762_s30, 32 }
 0x168   : > { %v679_v61 = vmul.f32 %v1501_v31, %v1501_v31  ;;  %v680_v63 = vmul.f32 %v1475_v25, %v1475_v25  ;;  %v681_v1 = vmul.f32 %v1493_v29, %v1493_v29  ;;  %v682_v3 = vmul.f32 %v1517_v35, %v1517_v35  ;;  %p1189_p7 = scmp.ne.s32.totalorder %s762_s30, %s1188_s24  ;;  %p1195_p13 = scmp.lt.s32.totalorder %s762_s30, %s762_s30 }
 0x169   : > { %v629_v9 = vadd.f32 %v628_v6, %v1547_v42  ;;  %v697_v11 = vadd.f32 %v696_v8, %v666_v4  ;;  %v683_v5 = vmul.f32 %v1533_v39, %v1533_v39  ;;  %p1196_p0 = scmp.lt.s32.totalorder %s1194_s26, %s1188_s24 }
 0x16a   : > { %p1190_p10 = pnand %p1189_p7, %p1791_p8 }
 0x16b   : > { %v630_v12 = vadd.f32 %v629_v9, %v1563_v46  ;;  %v698_v14 = vadd.f32 %v697_v11, %v667_v7  ;;  %v676_v46 = vmul.f32 %v1571_v48, %v1571_v48  ;;  %v684_v7 = vmul.f32 %v1509_v33, %v1509_v33  ;;  %p1197_p5 = por %p1196_p0, %p1195_p13 }
 0x16c   : > { %v685_v9 = vmul.f32 %v1525_v37, %v1525_v37  ;;  %v686_v11 = vmul.f32 %v1549_v43, %v1549_v43  ;;  %p1191_p11 = pneg %p1190_p10 }
 0x16d   : > { %v631_v15 = vadd.f32 %v1539_v40, %v630_v12  ;;  %v699_v17 = vadd.f32 %v698_v14, %v668_v10 }
 0x16e   : > { %p1198_p2 = pnand %p1197_p5, %p1191_p11 }
 0x16f   : > { %v632_v18 = vadd.f32 %v1555_v44, %v631_v15  ;;  %v700_v20 = vadd.f32 %v699_v17, %v669_v13  ;;  %v687_v13 = vmul.f32 %v1565_v47, %v1565_v47  ;;  %v688_v15 = vmul.f32 %v1541_v41, %v1541_v41 }
 0x170   : > { %v689_v17 = vmul.f32 %v1557_v45, %v1557_v45 }
 0x171   : > { %v633_v21 = vadd.f32 %v632_v18, %v1579_v50  ;;  %v701_v23 = vadd.f32 %v700_v20, %v670_v16 }
 0x173   : > { %v634_v24 = vadd.f32 %v633_v21, %v1595_v54  ;;  %v702_v28 = vadd.f32 %v701_v23, %v671_v19  ;;  %v690_v19 = vmul.f32 %v1581_v51, %v1581_v51  ;;  %v691_v21 = vmul.f32 %v1597_v55, %v1597_v55 }
 0x174   : > { %v692_v23 = vmul.f32 %v1573_v49, %v1573_v49 }
 0x175   : > { %v635_v30 = vadd.f32 %v1571_v48, %v634_v24  ;;  %v703_v34 = vadd.f32 %v702_v28, %v672_v22 }
 0x177   : > { %v636_v36 = vadd.f32 %v1587_v52, %v635_v30  ;;  %v704_v42 = vadd.f32 %v703_v34, %v673_v26 }
 0x179   : > { %v637_v40 = vadd.f32 %v636_v36, %v1485_v27  ;;  %v705_v56 = vadd.f32 %v704_v42, %v674_v32 }
 0x17b   : > { %v638_v44 = vadd.f32 %v637_v40, %v1501_v31  ;;  %v706_v58 = vadd.f32 %v705_v56, %v675_v38  ;;  %v621_v38 = vld [vmem:[#allocation8] sm:$0x1] }
 0x17d   : > { %v639_v50 = vadd.f32 %v1475_v25, %v638_v44  ;;  %v707_v60 = vadd.f32 %v706_v58, %v676_v46 }
 0x17f   : > { %v640_v54 = vadd.f32 %v1493_v29, %v639_v50  ;;  %v708_v62 = vadd.f32 %v707_v60, %v677_v57 }
 0x181   : > { %v641_v48 = vadd.f32 %v640_v54, %v1517_v35  ;;  %v709_v0 = vadd.f32 %v708_v62, %v678_v59 }
 0x183   : > { %v642_v52 = vadd.f32 %v641_v48, %v1533_v39  ;;  %v710_v2 = vadd.f32 %v709_v0, %v679_v61 }
 0x185   : > { %v643_v27 = vadd.f32 %v1509_v33, %v642_v52  ;;  %v711_v4 = vadd.f32 %v710_v2, %v680_v63 }
 0x187   : > { %v644_v31 = vadd.f32 %v1525_v37, %v643_v27  ;;  %v712_v6 = vadd.f32 %v711_v4, %v681_v1 }
 0x189   : > { %v645_v25 = vadd.f32 %v644_v31, %v1549_v43  ;;  %v713_v8 = vadd.f32 %v712_v6, %v682_v3 }
 0x18b   : > { %v646_v29 = vadd.f32 %v645_v25, %v1565_v47  ;;  %v714_v10 = vadd.f32 %v713_v8, %v683_v5 }
 0x18d   : > { %v647_v35 = vadd.f32 %v1541_v41, %v646_v29  ;;  %v715_v12 = vadd.f32 %v714_v10, %v684_v7 }
 0x18f   : > { %v648_v39 = vadd.f32 %v1557_v45, %v647_v35  ;;  %v716_v14 = vadd.f32 %v715_v12, %v685_v9  ;;  %v693_v45 = vmul.f32 %v1589_v53, %v1589_v53 }
 0x191   : > { %v649_v33 = vadd.f32 %v648_v39, %v1581_v51  ;;  %v717_v16 = vadd.f32 %v716_v14, %v686_v11 }
 0x193   : > { %v650_v37 = vadd.f32 %v649_v33, %v1597_v55  ;;  %v718_v18 = vadd.f32 %v717_v16, %v687_v13 }
 0x195   : > { %v651_v43 = vadd.f32 %v1573_v49, %v650_v37  ;;  %v719_v20 = vadd.f32 %v718_v18, %v688_v15 }
 0x197   : > { %v652_v47 = vadd.f32 %v1589_v53, %v651_v43  ;;  %v720_v22 = vadd.f32 %v719_v20, %v689_v17 }
 0x199   : > { %v653_v41 = vrot.slane %v652_v47, 4  ;;  %v721_v24 = vadd.f32 %v720_v22, %v690_v19 }
 0x19b   : > { %v654_v26 = vadd.f32 %v653_v41, %v652_v47  ;;  %v722_v28 = vadd.f32 %v721_v24, %v691_v21 }
 0x19d   : > { %v655_v30 = vrot.slane %v654_v26, 2  ;;  %v723_v32 = vadd.f32 %v722_v28, %v692_v23 }
 0x19f   : > { %v656_v51 = vadd.f32 %v655_v30, %v654_v26  ;;  %v724_v34 = vadd.f32 %v723_v32, %v693_v45 }
 0x1a1   : > { %v657_v36 = vrot.slane %v656_v51, 1  ;;  %v725_v42 = vrot.slane %v724_v34, 4 }
 0x1a3   : > { %v658_v55 = vadd.f32 %v657_v36, %v656_v51  ;;  %v726_v40 = vadd.f32 %v725_v42, %v724_v34 }
 0x1a5   : > { %v659_v46 = vadd.f32 %v658_v55, %v621_v38  ;;  %v727_v49 = vrot.slane %v726_v40, 2 }
 0x1a7   : > { %660 = vst [vmem:[#allocation8] sm:$0x1] %v659_v46  ;;  %v728_v56 = vadd.f32 %v727_v49, %v726_v40 }
 0x1a8   : > { %1201 = shalt.err (!%p1198_p2)
}
 0x1a9   : > { %p1792_p1 = pmov %p1791_p8  ;;  %v729_v53 = vrot.slane %v728_v56, 1  ;;  %v661_v44 = vld [vmem:[#allocation10] sm:$0x1]  ;;  %s1293_s14 = smov [#allocation10]  }
 0x1aa   : > { %s772_s11 = sshll.u32 %s1293_s14, 4  ;;  %s773_s11 = int_to_ptr.vmem [resolvable:$true] %s772_s11 }
 0x1ab   : > { %1016 = dma.vmem_to_hbm [thread:$0]  (%p1792_p1), %s762_s30, 16, %s1772_s3, [#allocation9]   ;;  %v730_v57 = vadd.f32 %v729_v53, %v728_v56 }
 0x1ac   : > { %s1212_s20 = scalar_lea.vmem %s773_s11, 16  ;;  %p1793_p6 = pmov %p1792_p1 }
 0x1ad   : > { %v731_v58 = vadd.f32 %v730_v57, %v661_v44  ;;  %p1213_p4 = scmp.ne.s32.totalorder %s773_s11, %s1212_s20  ;;  %s1218_s25 = scalar_lea.vmem %s773_s11, 32 }
 0x1ae   : > { %p1219_p12 = scmp.lt.s32.totalorder %s773_s11, %s773_s11  ;;  %p1220_p7 = scmp.lt.s32.totalorder %s1218_s25, %s1212_s20 }
 0x1af   : > { %732 = vst [vmem:[#allocation10] sm:$0x1] %v731_v58  ;;  %p1214_p9 = pnand %p1213_p4, %p1793_p6 }
 0x1b0   : > { %p1221_p8 = por %p1220_p7, %p1219_p12 }
 0x1b1   : > { %p1215_p3 = pneg %p1214_p9 }
 0x1b3   : > { %p1222_p10 = pnand %p1221_p8, %p1215_p3 }
 0x1b5   : > { %1225 = shalt.err (!%p1222_p10)
}
 0x1b6   : > { %p1794_p11 = pmov %p1792_p1  ;;  %p1795_p13 = pmov %p1792_p1 }
 0x1b8   : > { %1018 = dma.vmem_to_hbm [thread:$0]  (%p1794_p11), %s773_s11, 16, %s1773_s4, [#allocation9]  }
 0x1b9   : > { %1261 = dma.done.wait (%p1795_p13), [#allocation9], 32   ;;  %p1796_p0 = pmov %p1792_p1 }
 0x1bb   : > { %1263 = vsyncadd (%p1796_p0), [#allocation9], 4294967264 }
 0x1bc PF: > { %s792_s12 = sand.u32 1, %s1270_s15   ;;  %p1797_p5 = scmp.ne.s32.totalorder %s1779_s22, 0 }
 0x1bd   : > { %p1798_p2 = scmp.ge.s32.totalorder %s1282_s18, 2  ;;  %s793_s13 = scalar_lea.sflag [#allocation4], %s792_s12 }
 0x1bf   : > { %p1033_p1 = pnand %p1798_p2, %p1797_p5 }
 0x1c1   : > { %p1034_p4 = pneg %p1033_p1 }
 0x1c3   : > { %1265 = dma.done.wait (%p1034_p4), %s793_s13, 4096  }
 0x1c4   : > { %1267 = vsyncadd (%p1034_p4), %s793_s13, 4294963200  ;;  %p20_p6 = scmp.ge.s32.totalorder %s1374_s27, 4   ;;  %s1799_s15 = smov %s1274_s16 }
 0x1c5   : > { %s1800_s16 = smov %s1278_s17  ;;  %s1801_s17 = smov %s1394_s9 }
 0x1c6   : > { %s1802_s18 = smov %s1374_s27  ;;  %22 = sbr.rel (!%p20_p6) target bundleno = 7 (0x7), region = 97 }
 0x1cb   :  { %798 = vsyncpa [#allocation3], 1 }
 0x1cc   :  { %800 = vsyncpa [#allocation3 + $0x1], 1 }
 0x1cd   :  { %801 = vsyncpa [#allocation6], 1 }
 0x1ce   :  { %802 = vsyncpa [#allocation4], 1 }
 0x1cf   :  { %804 = vsyncpa [#allocation4 + $0x1], 1 }
 0x1d0   :  { %805 = vsyncpa [#allocation9], 1 }

</bundles_post_ra>
